<compile_context>
chip_gen: v6e
topology: v6e:2x2x1
jax: 0.10.0
libtpu: 0.0.40
codegen_flags: <defaults>
</compile_context>

<pallas_src>
import jax
import jax.numpy as jnp
from jax import lax
from jax.experimental import pallas as pl
from jax.experimental.pallas import tpu as pltpu


# ----------------------------------------------------------------------------
# Kernel
# ----------------------------------------------------------------------------
def _make_mlp_kernel(n_layers):
    """Fused MLP kernel for `n_layers` Linear layers.

    Ref order: x_ref, W1, b1, W2, b2, ..., Wn, bn, outT_ref
      x_ref : [T, d_in]        (row-major batch tile, straight from HBM)
      Wj    : [out_j, in_j]    (PyTorch-native Linear.weight layout)
      bj    : [out_j, 1]
      outT  : [d_out, T]       (batch tile on the lane axis -> lane-dense store)

    Semantics (DeepXDE_FNN.forward, activation='tanh', batchnorm=False,
    no input/output transforms):
        h = x
        for j in range(n_layers - 1): h = tanh(Wj @ h + bj)
        out = Wn @ h + bn
    """

    def kernel(*refs):
        x_ref = refs[0]
        o_ref = refs[-1]

        # ---- Layer 0: fold the transpose into the contraction --------------
        #   h[o, t] = sum_k W1[o, k] * x[t, k]   -> shape [d1, T]
        w0 = refs[1][...]
        b0 = refs[2][...]
        x = x_ref[...]
        if x.dtype != w0.dtype:
            x = x.astype(w0.dtype)          # keep MXU operands in param dtype
        h = lax.dot_general(
            w0, x,
            dimension_numbers=(((1,), (1,)), ((), ())),
            preferred_element_type=jnp.float32,
        ) + b0.astype(jnp.float32)
        if n_layers > 1:
            h = jnp.tanh(h)

        # ---- Remaining layers ----------------------------------------------
        for j in range(1, n_layers):
            w = refs[1 + 2 * j][...]
            b = refs[2 + 2 * j][...]
            # Feed the MXU operands in the parameter dtype (bf16 stays bf16,
            # f32 stays f32); always accumulate in f32.
            h_in = h if w.dtype == jnp.float32 else h.astype(w.dtype)
            h = jnp.dot(w, h_in, preferred_element_type=jnp.float32) \
                + b.astype(jnp.float32)
            if j < n_layers - 1:
                h = jnp.tanh(h)

        o_ref[...] = h.astype(o_ref.dtype)

    return kernel


# ----------------------------------------------------------------------------
# Tile selection
# ----------------------------------------------------------------------------
def _round_up(v, m):
    return ((v + m - 1) // m) * m


def _pick_tile(n, requested):
    """Lane-aligned batch tile: big to amortize per-step overhead, but clamped
    so grid >= 2 when there is enough work (v7x has two TensorCores)."""
    tile = min(requested, _round_up(n, 128))
    tile = max(128, (tile // 128) * 128)
    if n >= 256:
        half = _round_up((n + 1) // 2, 128)
        tile = min(tile, half)
    return tile


# ----------------------------------------------------------------------------
# Wrapper
# ----------------------------------------------------------------------------
def deepxde_fnn_forward(x, params, *, batch_tile=2048):
    """Run the fused MLP Pallas kernel.

    x:      [N, D_in]  (float32 or bfloat16)
    params: list of (W, b) with W: [out_j, in_j] (PyTorch layout), b: [out_j, 1]
    Returns [N, D_out] in x.dtype.
    """
    n, d_in = x.shape
    n_layers = len(params)
    d_out = params[-1][0].shape[0]

    tile = _pick_tile(n, batch_tile)
    grid = pl.cdiv(n, tile)                 # ragged tail handled by Pallas masking

    # BlockSpecs: tile the batch axis of x directly (no wrapper transpose);
    # weights & biases are whole-array, grid-invariant VMEM residents.
    in_specs = [pl.BlockSpec((tile, d_in), lambda i: (i, 0))]
    flat_args = [x]
    for (w, b) in params:
        in_specs.append(pl.BlockSpec(w.shape, lambda i: (0, 0)))
        in_specs.append(pl.BlockSpec(b.shape, lambda i: (0, 0)))
        flat_args.append(w)
        flat_args.append(b)

    # Output stays transposed in HBM: [d_out, N], batch on the lane axis
    # -> unmasked lane-dense vst even when d_out == 1.
    out_spec = pl.BlockSpec((d_out, tile), lambda i: (0, i))

    # Advisory cost estimate (actual issued work = grid * tile columns).
    n_work = grid * tile
    flops = 2 * n_work * sum(int(w.shape[0]) * int(w.shape[1]) for w, _ in params)
    transcendentals = n_work * sum(int(w.shape[0]) for w, _ in params[:-1])
    bytes_accessed = (
        x.size * x.dtype.itemsize
        + n * d_out * x.dtype.itemsize
        + sum(w.size * w.dtype.itemsize + b.size * b.dtype.itemsize
              for w, b in params)
    )

    out_t = pl.pallas_call(
        _make_mlp_kernel(n_layers),
        out_shape=jax.ShapeDtypeStruct((d_out, n), x.dtype),
        grid_spec=pltpu.PrefetchScalarGridSpec(
            num_scalar_prefetch=0,
            grid=(grid,),
            in_specs=in_specs,
            out_specs=out_spec,
        ),
        compiler_params=pltpu.CompilerParams(
            dimension_semantics=("parallel",),
        ),
        cost_estimate=pl.CostEstimate(
            flops=flops,
            transcendentals=transcendentals,
            bytes_accessed=bytes_accessed,
        ),
    )(*flat_args)

    # Back to PyTorch-style [N, D_out]. For d_out == 1 a reshape of the (1, N)
    # row is free; for d_out > 1 fall back to a transpose.
    if d_out == 1:
        return out_t.reshape(n, 1)
    return out_t.T


# ----------------------------------------------------------------------------
# Deterministic parameter init (Glorot normal weights, zero biases), matching
# DeepXDE_FNN(layer_sizes, activation="tanh", kernel_initializer="Glorot normal").
# Weights kept in PyTorch-native [out_features, in_features] layout.
# ----------------------------------------------------------------------------
def init_params(key, layer_sizes, dtype=jnp.float32):
    params = []
    for i in range(1, len(layer_sizes)):
        fan_in, fan_out = layer_sizes[i - 1], layer_sizes[i]
        key, sub = jax.random.split(key)
        std = jnp.sqrt(2.0 / (fan_in + fan_out)).astype(dtype)
        w = jax.random.normal(sub, (fan_out, fan_in), dtype=dtype) * std
        b = jnp.zeros((fan_out, 1), dtype=dtype)
        params.append((w, b))
    return params


def reference_forward(x, params):
    """Pure-JAX reference of DeepXDE_FNN.forward (tanh hidden activations)."""
    h = x
    for j, (w, b) in enumerate(params):
        h = h @ w.T + b[:, 0]
        if j < len(params) - 1:
            h = jnp.tanh(h)
    return h


# ----------------------------------------------------------------------------
# TODO(synk): optional _input_transform / _output_transform hooks and the
# batchnorm=True branch of DeepXDE_FNN are not implemented (defaults are off).
# ----------------------------------------------------------------------------
if __name__ == "__main__":
    layer_sizes = [4, 32, 32, 1]
    key = jax.random.PRNGKey(0)
    key, k_params = jax.random.split(key)
    params = init_params(k_params, layer_sizes)

    # Test 1: lane-aligned batch (grid of 2 steps -> exercises dual-TC path).
    batch = 512
    key, k_x = jax.random.split(key)
    x = jax.random.normal(k_x, (batch, layer_sizes[0]), dtype=jnp.float32)
    out = jax.block_until_ready(deepxde_fnn_forward(x, params))
    ref = reference_forward(x, params)
    assert out.shape == (batch, layer_sizes[-1])
    assert jnp.allclose(out, ref, atol=1e-4, rtol=1e-4), "mismatch vs reference (aligned)"

    # Test 2: ragged batch (not a multiple of 128) -> pad-free masked tail block.
    batch_r = 300
    key, k_xr = jax.random.split(key)
    xr = jax.random.normal(k_xr, (batch_r, layer_sizes[0]), dtype=jnp.float32)
    out_r = jax.block_until_ready(deepxde_fnn_forward(xr, params))
    ref_r = reference_forward(xr, params)
    assert out_r.shape == (batch_r, layer_sizes[-1])
    assert jnp.allclose(out_r, ref_r, atol=1e-4, rtol=1e-4), "mismatch vs reference (ragged)"

    print("KERNEL_OK")
</pallas_src>

<mosaic_0001>
module attributes {stable_mosaic.version = 11 : i64} {
  func.func @kernel(%arg0: i32, %arg1: memref<256x4xf32, #tpu.memory_space<vmem>>, %arg2: memref<32x4xf32, #tpu.memory_space<vmem>>, %arg3: memref<32x1xf32, #tpu.memory_space<vmem>>, %arg4: memref<32x32xf32, #tpu.memory_space<vmem>>, %arg5: memref<32x1xf32, #tpu.memory_space<vmem>>, %arg6: memref<1x32xf32, #tpu.memory_space<vmem>>, %arg7: memref<1x1xf32, #tpu.memory_space<vmem>>, %arg8: memref<1x256xf32, #tpu.memory_space<vmem>>) attributes {dimension_semantics = [#tpu.dimension_semantics<parallel>], iteration_bounds = array<i64: 2>, scalar_prefetch = 0 : i64, scratch_operands = 0 : i64, tpu.core_type = #tpu.core_type<tc>, window_params = [{transform_indices = @transform_0, window_bounds = array<i64: 256, 4>}, {pipeline_mode = #tpu.pipeline_mode<synchronous>, transform_indices = @transform_1, window_bounds = array<i64: 32, 4>}, {pipeline_mode = #tpu.pipeline_mode<synchronous>, transform_indices = @transform_2, window_bounds = array<i64: 32, 1>}, {pipeline_mode = #tpu.pipeline_mode<synchronous>, transform_indices = @transform_3, window_bounds = array<i64: 32, 32>}, {pipeline_mode = #tpu.pipeline_mode<synchronous>, transform_indices = @transform_4, window_bounds = array<i64: 32, 1>}, {pipeline_mode = #tpu.pipeline_mode<synchronous>, transform_indices = @transform_5, window_bounds = array<i64: 1, 32>}, {pipeline_mode = #tpu.pipeline_mode<synchronous>, transform_indices = @transform_6, window_bounds = array<i64: 1, 1>}, {transform_indices = @transform_7, window_bounds = array<i64: 1, 256>}]} {
    %c0 = arith.constant 0 : index
    %c0_0 = arith.constant 0 : index
    %0 = vector.load %arg2[%c0, %c0_0] : memref<32x4xf32, #tpu.memory_space<vmem>>, vector<32x4xf32>
    %c0_1 = arith.constant 0 : index
    %c0_2 = arith.constant 0 : index
    %1 = vector.load %arg3[%c0_1, %c0_2] : memref<32x1xf32, #tpu.memory_space<vmem>>, vector<32x1xf32>
    %c0_3 = arith.constant 0 : index
    %c0_4 = arith.constant 0 : index
    %2 = vector.load %arg1[%c0_3, %c0_4] : memref<256x4xf32, #tpu.memory_space<vmem>>, vector<256x4xf32>
    %cst = arith.constant dense<0.000000e+00> : vector<32x256xf32>
    %3 = tpu.matmul %0, %2, %cst {dimension_numbers = #tpu.dot_dimension_numbers<[1], [1], [0], [0], [0, 0, 1, 0], [], []>} : vector<32x4xf32>, vector<256x4xf32>, vector<32x256xf32> -> vector<32x256xf32>
    %4 = vector.broadcast %1 : vector<32x1xf32> to vector<32x256xf32>
    %5 = arith.addf %3, %4 : vector<32x256xf32>
    %6 = math.tanh %5 : vector<32x256xf32>
    %c0_5 = arith.constant 0 : index
    %c0_6 = arith.constant 0 : index
    %7 = vector.load %arg4[%c0_5, %c0_6] : memref<32x32xf32, #tpu.memory_space<vmem>>, vector<32x32xf32>
    %c0_7 = arith.constant 0 : index
    %c0_8 = arith.constant 0 : index
    %8 = vector.load %arg5[%c0_7, %c0_8] : memref<32x1xf32, #tpu.memory_space<vmem>>, vector<32x1xf32>
    %cst_9 = arith.constant dense<0.000000e+00> : vector<32x256xf32>
    %9 = tpu.matmul %7, %6, %cst_9 {dimension_numbers = #tpu.dot_dimension_numbers<[1], [0], [0], [1], [0, 0, 1, 1], [], []>} : vector<32x32xf32>, vector<32x256xf32>, vector<32x256xf32> -> vector<32x256xf32>
    %10 = vector.broadcast %8 : vector<32x1xf32> to vector<32x256xf32>
    %11 = arith.addf %9, %10 : vector<32x256xf32>
    %12 = math.tanh %11 : vector<32x256xf32>
    %c0_10 = arith.constant 0 : index
    %c0_11 = arith.constant 0 : index
    %13 = vector.load %arg6[%c0_10, %c0_11] : memref<1x32xf32, #tpu.memory_space<vmem>>, vector<1x32xf32>
    %c0_12 = arith.constant 0 : index
    %c0_13 = arith.constant 0 : index
    %14 = vector.load %arg7[%c0_12, %c0_13] : memref<1x1xf32, #tpu.memory_space<vmem>>, vector<1x1xf32>
    %cst_14 = arith.constant dense<0.000000e+00> : vector<1x256xf32>
    %15 = tpu.matmul %13, %12, %cst_14 {dimension_numbers = #tpu.dot_dimension_numbers<[1], [0], [0], [1], [0, 0, 1, 1], [], []>} : vector<1x32xf32>, vector<32x256xf32>, vector<1x256xf32> -> vector<1x256xf32>
    %16 = vector.broadcast %14 : vector<1x1xf32> to vector<1x256xf32>
    %17 = arith.addf %15, %16 : vector<1x256xf32>
    %c0_15 = arith.constant 0 : index
    %c0_16 = arith.constant 0 : index
    %18 = vector.load %arg8[%c0_15, %c0_16] : memref<1x256xf32, #tpu.memory_space<vmem>>, vector<1x256xf32>
    tpu.vector_store %arg8[%c0_15, %c0_16], %17 {strides = array<i32>} : memref<1x256xf32, #tpu.memory_space<vmem>>, vector<1x256xf32>,
    return
  }
  func.func @transform_0(%arg0: i32) -> (i32, i32) {
    %c0_i32 = arith.constant 0 : i32
    %c0_i32_0 = arith.constant 0 : i32
    return %arg0, %c0_i32 : i32, i32
  }
  func.func @transform_1(%arg0: i32) -> (i32, i32) {
    %c0_i32 = arith.constant 0 : i32
    %c0_i32_0 = arith.constant 0 : i32
    %c0_i32_1 = arith.constant 0 : i32
    return %c0_i32, %c0_i32_0 : i32, i32
  }
  func.func @transform_2(%arg0: i32) -> (i32, i32) {
    %c0_i32 = arith.constant 0 : i32
    %c0_i32_0 = arith.constant 0 : i32
    %c0_i32_1 = arith.constant 0 : i32
    return %c0_i32, %c0_i32_0 : i32, i32
  }
  func.func @transform_3(%arg0: i32) -> (i32, i32) {
    %c0_i32 = arith.constant 0 : i32
    %c0_i32_0 = arith.constant 0 : i32
    %c0_i32_1 = arith.constant 0 : i32
    return %c0_i32, %c0_i32_0 : i32, i32
  }
  func.func @transform_4(%arg0: i32) -> (i32, i32) {
    %c0_i32 = arith.constant 0 : i32
    %c0_i32_0 = arith.constant 0 : i32
    %c0_i32_1 = arith.constant 0 : i32
    return %c0_i32, %c0_i32_0 : i32, i32
  }
  func.func @transform_5(%arg0: i32) -> (i32, i32) {
    %c0_i32 = arith.constant 0 : i32
    %c0_i32_0 = arith.constant 0 : i32
    %c0_i32_1 = arith.constant 0 : i32
    return %c0_i32, %c0_i32_0 : i32, i32
  }
  func.func @transform_6(%arg0: i32) -> (i32, i32) {
    %c0_i32 = arith.constant 0 : i32
    %c0_i32_0 = arith.constant 0 : i32
    %c0_i32_1 = arith.constant 0 : i32
    return %c0_i32, %c0_i32_0 : i32, i32
  }
  func.func @transform_7(%arg0: i32) -> (i32, i32) {
    %c0_i32 = arith.constant 0 : i32
    %c0_i32_0 = arith.constant 0 : i32
    return %c0_i32, %arg0 : i32, i32
  }
}

</mosaic_0001>

<bundles_post_ra>
// kernel: tpu_custom_call.1
= control target key start
LH: loop header
LB: loop body
LE: loop exit
PB: predicated region body
PF: predicated region fallthrough
CT: control target
= control target key end

     0   :  { %s1367_s0 = inlined_call_operand.vmem [shape: f32[512,4], index: 0, kind: input, shape index: {}]   ;;  %s1368_s1 = inlined_call_operand.vmem [shape: f32[32,4], index: 1, kind: input, shape index: {}]   ;;  %s1369_s2 = inlined_call_operand.vmem [shape: f32[32,1], index: 2, kind: input, shape index: {}]   ;;  %s1370_s3 = inlined_call_operand.vmem [shape: f32[32,32], index: 3, kind: input, shape index: {}]   ;;  %s1371_s4 = inlined_call_operand.vmem [shape: f32[32,1], index: 4, kind: input, shape index: {}]   ;;  %s1372_s5 = inlined_call_operand.vmem [shape: f32[1,32], index: 5, kind: input, shape index: {}]   ;;  %s1373_s6 = inlined_call_operand.<no memory space> [shape: f32[1,1], index: 6, kind: input, shape index: {}]   ;;  %s1374_s7 = inlined_call_operand.hbm [shape: f32[1,512], index: 7, kind: output, shape index: {}]  }
   0x1   :  { %v12_v0 = vstv %s1373_s6 }
   0x2   :  { %13 = vst [vmem:[#allocation2] sm:$0x1] %v12_v0 }
   0x3   :  { %14 = vsyncpa [#allocation4], 0 }
   0x4   :  { %16 = vsyncpa [#allocation4 + $0x1], 0  ;;  %s1147_s26 = smov 0   ;;  %s1149_s27 = smov 0  }
   0x5   :  { %s1151_s28 = smov 0   ;;  %s1153_s29 = smov 0  }
   0x6 LB: > { %s867_s6 = sadd.s32 4294967295, %s1098_s29   ;;  %s868_s30 = sadd.s32 4294967294, %s1098_s29   ;;  %s1098_s29 = sphi %s1153_s29, %s1380_s29   ;;  %s1094_s28 = sphi %s1151_s28, %s1379_s28   ;;  %s1090_s27 = sphi %s1149_s27, %s1378_s27   ;;  %s1086_s26 = sphi %s1147_s26, %s1377_s26  }
   0x7   : > { %s1170_s8 = sadd.s32 1, %s1098_s29   ;;  %s181_s9 = sadd.s32 1, %s1094_s28 }
   0x8   : > { %s178_s10 = ssub.s32 %s1098_s29, %s1170_s8  ;;  %p191_p0 = scmp.ne.s32.totalorder %s1094_s28, %s1090_s27 }
   0x9   : > { %p179_p1 = scmp.eq.s32.totalorder %s178_s10, 0  ;;  %p192_p2 = scmp.eq.s32.totalorder %s867_s6, 1 }
   0xa   : > { %p197_p3 = scmp.ne.s32.totalorder %s1090_s27, %s1086_s26  ;;  %p198_p4 = scmp.eq.s32.totalorder %s868_s30, 1 }
   0xb   : > { %s1180_s11 = scalar_select %p179_p1, %s1094_s28, %s181_s9  }
   0xc   : > { %p1182_p5 = por %p192_p2, %p191_p0  ;;  %p1186_p6 = por %p198_p4, %p197_p3 }
   0xd   : > { %p871_p7 = scmp.ge.s32.totalorder %s1098_s29, 1  ;;  %p243_p8 = scmp.lt.s32.totalorder %s1098_s29, 3 }
   0xf   : > { %p244_p9 = pnand %p871_p7, %p243_p8 }
  0x10   : > { %s1192_s14 = sshll.u32 (!%p244_p9), %s867_s6, 5  ;;  %s272_s24 = sand.u32 (!%p244_p9), 1, %s1090_s27  }
  0x11   : > { %247 = sbr.rel (%p244_p9) target bundleno = 769 (0x301), region = 48  ;;  %p276_p10 = scmp.lt.s32.totalorder (!%p244_p9), %s1192_s14, 63 }
  0x12   : > { %s872_s25 = sshll.u32 (!%p244_p9), %s272_s24, 1  ;;  %s807_s15 = scalar_lea.hbm (!%p244_p9), %s1374_s7, %s1192_s14 }
  0x13   : > { %s795_s16 = scalar_lea.sflag (!%p244_p9), [#allocation4], %s272_s24  ;;  %s1103_s18 = smov (!%p244_p9), [#allocation3]  }
  0x14   : > { %s1042_s19 = sshll.u32 (!%p244_p9), %s1103_s18, 4  ;;  %s1043_s19 = int_to_ptr.vmem [resolvable:$false] %s1042_s19 }
  0x15   : > { %s1044_s20 = scalar_lea.vmem (!%p244_p9), %s1043_s19, 64 }
  0x16   : > { %vm342_vm0 = vcmask 31744   ;;  %v1197_v1 = vld [vmem:[%s1368_s1] sm:$0xff]  ;;  %v1100_v2 = vmov 0   ;;  %v289_v3 = vld [vmem:[%s1369_s2 + $0x18] sm:$0xff]  ;;  %v287_v4 = vld [vmem:[%s1369_s2 + $0x8] sm:$0xff]  ;;  %s277_s21 = scalar_select %p276_p10, %s1192_s14, 63 }
  0x17   : > { %954 = vmatprep.mubr.msk.f32.mxu0 %vm342_vm0, %v1197_v1  ;;  %1005 = vset.pattern.permute.xlu1 %v1100_v2  ;;  %v286_v5 = vld [vmem:[%s1369_s2] sm:$0xff]  ;;  %v288_v6 = vld [vmem:[%s1369_s2 + $0x10] sm:$0xff]  ;;  %v555_v11 = vld [vmem:[%s1371_s4 + $0x18] sm:$0xff]  ;;  %v1101_v47 = vmov 0.0   ;;  %vm576_vm1 = vcmask 261120  }
  0x18   : > { %1004 = vset.pattern.permute.xlu0 %v1100_v2  ;;  %329 = vperm.xlu1 %1005, %v287_v4   ;;  %s874_s6 = sshll.u32 %s277_s21, 3  ;;  %v554_v7 = vld [vmem:[%s1371_s4 + $0x10] sm:$0xff]  ;;  %v552_v14 = vld [vmem:[%s1371_s4] sm:$0xff]  ;;  %v553_v15 = vld [vmem:[%s1371_s4 + $0x8] sm:$0xff] }
  0x19   : > { %339 = vperm.xlu0 %1004, %v289_v3   ;;  %s1218_s10 = scalar_lea.vmem %s1367_s0, %s874_s6  ;;  %v687_v18 = vld [vmem:[#allocation2] sm:$0x1]  ;;  %v283_v44 = vld [vmem:[%s1368_s1 + $0x8] sm:$0xff]  ;;  %v284_v45 = vld [vmem:[%s1368_s1 + $0x10] sm:$0xff]  ;;  %653 = vmatprep.mubr.f32.mxu1 %v1101_v47  ;;  %s274_s6 = scalar_lea.vmem [#allocation3], %s872_s25 }
  0x1a   : > { %v321_v8 = vld [vmem:[%s1218_s10 + $0xf8] sm:$0xff]  ;;  %v320_v10 = vld [vmem:[%s1218_s10 + $0xf0] sm:$0xff]  ;;  %v319_v13 = vld [vmem:[%s1218_s10 + $0xe8] sm:$0xff]  ;;  %s809_s30 = sshll.u32 %s274_s6, 4  ;;  %s810_s30 = int_to_ptr.vmem [resolvable:$true] %s809_s30 }
  0x1b   : > { %v305_v9 = vld [vmem:[%s1218_s10 + $0x78] sm:$0xff]  ;;  %922 = vmatprep.subr.msk.mxu0 %vm342_vm0, %v321_v8  ;;  %v304_v12 = vld [vmem:[%s1218_s10 + $0x70] sm:$0xff]  ;;  %v303_v16 = vld [vmem:[%s1218_s10 + $0x68] sm:$0xff]  ;;  %s1038_s17 = scalar_lea.vmem %s810_s30, 32  ;;  %p1045_p0 = scmp.lt.s32.totalorder %s810_s30, %s1043_s19 }
  0x1c   : > { %324 = vperm.xlu1 %1005, %v286_v5   ;;  %923 = vmatpush3.xpose.msk.msra.mxu0 %vm342_vm0, %v305_v9  ;;  %v318_v17 = vld [vmem:[%s1218_s10 + $0xe0] sm:$0xff]  ;;  %v317_v20 = vld [vmem:[%s1218_s10 + $0xd8] sm:$0xff]  ;;  %v316_v22 = vld [vmem:[%s1218_s10 + $0xd0] sm:$0xff]  ;;  %p1039_p11 = scmp.ne.s32.totalorder %s810_s30, %s1038_s17  ;;  %p1046_p1 = scmp.lt.s32.totalorder %s1044_s20, %s1038_s17 }
  0x1d   : > { %334 = vperm.xlu0 %1004, %v288_v6   ;;  %924 = vmatprep.subr.msk.mxu0 %vm342_vm0, %v320_v10  ;;  %v302_v19 = vld [vmem:[%s1218_s10 + $0x60] sm:$0xff]  ;;  %v301_v21 = vld [vmem:[%s1218_s10 + $0x58] sm:$0xff]  ;;  %v300_v23 = vld [vmem:[%s1218_s10 + $0x50] sm:$0xff] }
  0x1e   : > { %v315_v24 = vld [vmem:[%s1218_s10 + $0xc8] sm:$0xff]  ;;  %v314_v26 = vld [vmem:[%s1218_s10 + $0xc0] sm:$0xff]  ;;  %v313_v28 = vld [vmem:[%s1218_s10 + $0xb8] sm:$0xff]  ;;  %p1040_p12 = pnand %p1039_p11, %p1182_p5  ;;  %p1047_p2 = por %p1046_p1, %p1045_p0 }
  0x1f   : > { %v299_v25 = vld [vmem:[%s1218_s10 + $0x48] sm:$0xff]  ;;  %v298_v27 = vld [vmem:[%s1218_s10 + $0x40] sm:$0xff]  ;;  %v297_v29 = vld [vmem:[%s1218_s10 + $0x38] sm:$0xff] }
  0x20   : > { %568 = vperm.xlu1 %1005, %v554_v7   ;;  %925 = vmatpush3.xpose.msk.msra.mxu0 %vm342_vm0, %v304_v12  ;;  %v312_v30 = vld [vmem:[%s1218_s10 + $0xb0] sm:$0xff]  ;;  %v311_v32 = vld [vmem:[%s1218_s10 + $0xa8] sm:$0xff]  ;;  %v310_v34 = vld [vmem:[%s1218_s10 + $0xa0] sm:$0xff]  ;;  %p1041_p13 = pneg %p1040_p12 }
  0x21   : > { %573 = vperm.xlu0 %1004, %v555_v11   ;;  %926 = vmatprep.subr.msk.mxu0 %vm342_vm0, %v319_v13  ;;  %v296_v31 = vld [vmem:[%s1218_s10 + $0x30] sm:$0xff]  ;;  %v295_v33 = vld [vmem:[%s1218_s10 + $0x28] sm:$0xff]  ;;  %v294_v35 = vld [vmem:[%s1218_s10 + $0x20] sm:$0xff] }
  0x22   : > { %v309_v36 = vld [vmem:[%s1218_s10 + $0x98] sm:$0xff]  ;;  %v308_v38 = vld [vmem:[%s1218_s10 + $0x90] sm:$0xff]  ;;  %v307_v40 = vld [vmem:[%s1218_s10 + $0x88] sm:$0xff]  ;;  %p1048_p3 = pnand %p1047_p2, %p1041_p13 }
  0x23   : > { %v293_v37 = vld [vmem:[%s1218_s10 + $0x18] sm:$0xff]  ;;  %v292_v39 = vld [vmem:[%s1218_s10 + $0x10] sm:$0xff]  ;;  %v291_v41 = vld [vmem:[%s1218_s10 + $0x8] sm:$0xff] }
  0x24   : > { %558 = vperm.xlu1 %1005, %v552_v14   ;;  %927 = vmatpush3.xpose.msk.msra.mxu0 %vm342_vm0, %v303_v16  ;;  %v306_v42 = vld [vmem:[%s1218_s10 + $0x80] sm:$0xff]  ;;  %v285_v46 = vld [vmem:[%s1368_s1 + $0x18] sm:$0xff]  ;;  %v549_v13 = vld [vmem:[%s1370_s3 + $0x8] sm:$0xff] }
  0x25   : > { %563 = vperm.xlu0 %1004, %v553_v15   ;;  %928 = vmatprep.subr.msk.mxu0 %vm342_vm0, %v318_v17  ;;  %v290_v43 = vld [vmem:[%s1218_s10] sm:$0xff]  ;;  %v550_v14 = vld [vmem:[%s1370_s3 + $0x10] sm:$0xff]  ;;  %v551_v15 = vld [vmem:[%s1370_s3 + $0x18] sm:$0xff] }
  0x26   : > { %v548_v11 = vld [vmem:[%s1370_s3] sm:$0xff] }
  0x28   : > { %929 = vmatpush3.xpose.msk.msra.mxu0 %vm342_vm0, %v302_v19 }
  0x29   : > { %690 = vperm.xlu0 %1004, %v687_v18   ;;  %930 = vmatprep.subr.msk.mxu0 %vm342_vm0, %v317_v20 }
  0x2c   : > { %931 = vmatpush3.xpose.msk.msra.mxu0 %vm342_vm0, %v301_v21 }
  0x2d   : > { %932 = vmatprep.subr.msk.mxu0 %vm342_vm0, %v316_v22 }
  0x30   : > { %933 = vmatpush3.xpose.msk.msra.mxu0 %vm342_vm0, %v300_v23 }
  0x31   : > { %934 = vmatprep.subr.msk.mxu0 %vm342_vm0, %v315_v24 }
  0x34   : > { %935 = vmatpush3.xpose.msk.msra.mxu0 %vm342_vm0, %v299_v25 }
  0x35   : > { %936 = vmatprep.subr.msk.mxu0 %vm342_vm0, %v314_v26 }
  0x38   : > { %937 = vmatpush3.xpose.msk.msra.mxu0 %vm342_vm0, %v298_v27 }
  0x39   : > { %938 = vmatprep.subr.msk.mxu0 %vm342_vm0, %v313_v28 }
  0x3c   : > { %939 = vmatpush3.xpose.msk.msra.mxu0 %vm342_vm0, %v297_v29 }
  0x3d   : > { %940 = vmatprep.subr.msk.mxu0 %vm342_vm0, %v312_v30 }
  0x40   : > { %941 = vmatpush3.xpose.msk.msra.mxu0 %vm342_vm0, %v296_v31 }
  0x41   : > { %942 = vmatprep.subr.msk.mxu0 %vm342_vm0, %v311_v32 }
  0x44   : > { %943 = vmatpush3.xpose.msk.msra.mxu0 %vm342_vm0, %v295_v33 }
  0x45   : > { %944 = vmatprep.subr.msk.mxu0 %vm342_vm0, %v310_v34 }
  0x48   : > { %945 = vmatpush3.xpose.msk.msra.mxu0 %vm342_vm0, %v294_v35 }
  0x49   : > { %946 = vmatprep.subr.msk.mxu0 %vm342_vm0, %v309_v36 }
  0x4c   : > { %947 = vmatpush3.xpose.msk.msra.mxu0 %vm342_vm0, %v293_v37 }
  0x4d   : > { %948 = vmatprep.subr.msk.mxu0 %vm342_vm0, %v308_v38 }
  0x50   : > { %949 = vmatpush3.xpose.msk.msra.mxu0 %vm342_vm0, %v292_v39 }
  0x51   : > { %950 = vmatprep.subr.msk.mxu0 %vm342_vm0, %v307_v40 }
  0x54   : > { %951 = vmatpush3.xpose.msk.msra.mxu0 %vm342_vm0, %v291_v41 }
  0x55   : > { %952 = vmatprep.subr.msk.mxu0 %vm342_vm0, %v306_v42 }
  0x58   : > { %953 = vmatpush3.xpose.msk.msra.mxu0 %vm342_vm0, %v290_v43  ;;  %v686_v43 = vld [vmem:[%s1372_s5] sm:$0x1] }
  0x5b   : > { %955 = vmatmul.mubr.msk.f32.vlgmr.msra.gmra.mxu0 %vm342_vm0, %v1197_v1 }
  0x5c   : > { %956 = vmatprep.mubr.msk.f32.mxu0 %vm342_vm0, %v283_v44 }
  0x5f   : > { %957 = vmatmul.mubr.msk.f32.gmra.mxu0 %vm342_vm0, %v283_v44 }
  0x60   : > { %958 = vmatprep.mubr.msk.f32.mxu0 %vm342_vm0, %v284_v45 }
  0x63   : > { %959 = vmatmul.mubr.msk.f32.gmra.mxu0 %vm342_vm0, %v284_v45  ;;  %v693_v45 = vlaneseq }
  0x64   : > { %960 = vmatprep.mubr.msk.f32.mxu0 %vm342_vm0, %v285_v46 }
  0x65   : > { %vm791_vm2 = vcmp.lt.s32.totalorder %v693_v45, 256 }
  0x67   : > { %961 = vmatmul.mubr.msk.f32.gmra.mxu0 %vm342_vm0, %v285_v46  ;;  %v694_v46 = vshrl.u32 %v693_v45, 7 }
  0x93   : > { %v330_v55 = vpop.permute.xlu1 %329 }
  0x94   : > { %v340_v52 = vpop.permute.xlu0 %339 }
  0x97   : > { %v325_v63 = vpop.permute.xlu1 %324 }
  0x98   : > { %v335_v57 = vpop.permute.xlu0 %334 }
  0x9b   : > { %v569_v23 = vpop.permute.xlu1 %568 }
  0x9c   : > { %v574_v21 = vpop.permute.xlu0 %573 }
  0x9f   : > { %v559_v32 = vpop.permute.xlu1 %558 }
  0xa0   : > { %v564_v29 = vpop.permute.xlu0 %563 }
 0x11b   : > { %v517_v48 = vpop.f32.mrf.mxu0 }
 0x11c   : > { %v518_v3 = vadd.f32 %v517_v48, %v325_v63 }
 0x11d   : > { %v519_v49 = vpop.f32.mrf.mxu0 }
 0x11e   : > { %v520_v2 = vadd.f32 %v519_v49, %v325_v63  ;;  %v695_v49 = vsub.s32 0, %v694_v46 }
 0x11f   : > { %v523_v50 = vpop.f32.mrf.mxu0 }
 0x120   : > { %v524_v1 = vadd.f32 %v523_v50, %v330_v55  ;;  %v691_v50 = vpop.permute.xlu0 %690 }
 0x121   : > { %v525_v51 = vpop.f32.mrf.mxu0 }
 0x122   : > { %v526_v0 = vadd.f32 %v525_v51, %v330_v55 }
 0x123   : > { %v529_v53 = vpop.f32.mrf.mxu0 }
 0x124   : > { %v530_v62 = vadd.f32 %v529_v53, %v335_v57  ;;  %v696_v53 = vrot.slane %v691_v50, %v695_v49 }
 0x125   : > { %v531_v54 = vpop.f32.mrf.mxu0 }
 0x126   : > { %v532_v60 = vadd.f32 %v531_v54, %v335_v57 }
 0x127   : > { %v535_v56 = vpop.f32.mrf.mxu0 }
 0x128   : > { %v536_v58 = vadd.f32 %v535_v56, %v340_v52 }
 0x129   : > { %v537_v59 = vpop.f32.mrf.mxu0 }
 0x12a   : > { %v538_v61 = vadd.f32 %v537_v59, %v340_v52 }
 0x12c   : > { %1006 = vtanh.f32 %v538_v61 }
 0x12d   : > { %1008 = vtanh.f32 %v536_v58 }
 0x12e   : > { %1010 = vtanh.f32 %v532_v60 }
 0x12f   : > { %1012 = vtanh.f32 %v530_v62 }
 0x130   : > { %1014 = vtanh.f32 %v526_v0 }
 0x131   : > { %1016 = vtanh.f32 %v524_v1 }
 0x132   : > { %1018 = vtanh.f32 %v520_v2 }
 0x133   : > { %1020 = vtanh.f32 %v518_v3 }
 0x139   : > { %v1007_v4 = vpop.eup %1006 }
 0x13a   : > { %v1009_v5 = vpop.eup %1008  ;;  %613 = vmatprep.subr.mxu1 %v1007_v4 }
 0x13b   : > { %v1011_v6 = vpop.eup %1010  ;;  %614 = vmatpush1.msra.mxu1 %v1009_v5 }
 0x13c   : > { %v1013_v7 = vpop.eup %1012  ;;  %615 = vmatprep.subr.mxu1 %v1011_v6 }
 0x13d   : > { %v1015_v8 = vpop.eup %1014  ;;  %616 = vmatpush1.msra.mxu1 %v1013_v7 }
 0x13e   : > { %v1017_v9 = vpop.eup %1016  ;;  %617 = vmatprep.subr.mxu1 %v1015_v8 }
 0x13f   : > { %v1019_v10 = vpop.eup %1018  ;;  %618 = vmatpush1.msra.mxu1 %v1017_v9 }
 0x140   : > { %v1021_v12 = vpop.eup %1020  ;;  %619 = vmatprep.subr.mxu1 %v1019_v10 }
 0x141   : > { %620 = vmatpush1.msra.mxu1 %v1021_v12 }
 0x142   : > { %911 = vmatmul.mubr.msk.f32.vlgmr.msra.gmra.mxu1 %vm576_vm1, %v548_v11 }
 0x143   : > { %659 = vmatprep.mubr.f32.mxu1 %v1101_v47 }
 0x146   : > { %912 = vmatmul.mubr.msk.f32.gmra.mxu1 %vm576_vm1, %v549_v13 }
 0x147   : > { %665 = vmatprep.mubr.f32.mxu1 %v1101_v47 }
 0x14a   : > { %913 = vmatmul.mubr.msk.f32.gmra.mxu1 %vm576_vm1, %v550_v14 }
 0x14b   : > { %671 = vmatprep.mubr.f32.mxu1 %v1101_v47 }
 0x14e   : > { %914 = vmatmul.mubr.msk.f32.gmra.mxu1 %vm576_vm1, %v551_v15 }
 0x14f   : > { %764 = vmatprep.mubr.f32.mxu1 %v1101_v47  ;;  %v1102_v47 = vmov 1966171168  }
 0x150   : > { %v775_v48 = vunpack.c.l.s4 %v1102_v47 }
 0x152   : > { %v776_v51 = vunpack.c.0.s8 %v775_v48 }
 0x154   : > { %v779_v57 = vsub.s32 %v776_v51, %v694_v46 }
 0x202   : > { %v655_v16 = vpop.f32.mrf.mxu1 }
 0x203   : > { %v656_v35 = vadd.f32 %v655_v16, %v559_v32 }
 0x204   : > { %v657_v17 = vpop.f32.mrf.mxu1 }
 0x205   : > { %v658_v34 = vadd.f32 %v657_v17, %v559_v32 }
 0x206   : > { %v661_v18 = vpop.f32.mrf.mxu1 }
 0x207   : > { %v662_v33 = vadd.f32 %v661_v18, %v564_v29 }
 0x208   : > { %v663_v19 = vpop.f32.mrf.mxu1 }
 0x209   : > { %v664_v31 = vadd.f32 %v663_v19, %v564_v29 }
 0x20a   : > { %v667_v20 = vpop.f32.mrf.mxu1 }
 0x20b   : > { %v668_v30 = vadd.f32 %v667_v20, %v569_v23 }
 0x20c   : > { %v669_v22 = vpop.f32.mrf.mxu1 }
 0x20d   : > { %v670_v27 = vadd.f32 %v669_v22, %v569_v23 }
 0x20e   : > { %v673_v24 = vpop.f32.mrf.mxu1 }
 0x20f   : > { %v674_v25 = vadd.f32 %v673_v24, %v574_v21 }
 0x210   : > { %v675_v26 = vpop.f32.mrf.mxu1 }
 0x211   : > { %v676_v28 = vadd.f32 %v675_v26, %v574_v21 }
 0x213   : > { %1022 = vtanh.f32 %v676_v28 }
 0x214   : > { %1024 = vtanh.f32 %v674_v25 }
 0x215   : > { %1026 = vtanh.f32 %v670_v27 }
 0x216   : > { %1028 = vtanh.f32 %v668_v30 }
 0x217   : > { %1030 = vtanh.f32 %v664_v31 }
 0x218   : > { %1032 = vtanh.f32 %v662_v33 }
 0x219   : > { %1034 = vtanh.f32 %v658_v34 }
 0x21a   : > { %1036 = vtanh.f32 %v656_v35 }
 0x220   : > { %v1023_v36 = vpop.eup %1022 }
 0x221   : > { %v1025_v37 = vpop.eup %1024  ;;  %724 = vmatprep.subr.mxu1 %v1023_v36 }
 0x222   : > { %v1027_v38 = vpop.eup %1026  ;;  %725 = vmatpush1.msra.mxu1 %v1025_v37 }
 0x223   : > { %v1029_v39 = vpop.eup %1028  ;;  %726 = vmatprep.subr.mxu1 %v1027_v38 }
 0x224   : > { %v1031_v40 = vpop.eup %1030  ;;  %727 = vmatpush1.msra.mxu1 %v1029_v39 }
 0x225   : > { %v1033_v41 = vpop.eup %1032  ;;  %728 = vmatprep.subr.mxu1 %v1031_v40 }
 0x226   : > { %v1035_v42 = vpop.eup %1034  ;;  %729 = vmatpush1.msra.mxu1 %v1033_v41 }
 0x227   : > { %v1037_v44 = vpop.eup %1036  ;;  %730 = vmatprep.subr.mxu1 %v1035_v42 }
 0x228   : > { %731 = vmatpush1.msra.mxu1 %v1037_v44 }
 0x229   : > { %915 = vmatmul.mubr.msk.f32.vlgmr.msra.gmra.mxu1 %vm576_vm1, %v686_v43 }
 0x2e9   : > { %v766_v52 = vpop.f32.mrf.mxu1 }
 0x2ea   : > { %v767_v55 = vadd.f32 %v766_v52, %v696_v53 }
 0x2eb   : > { %v768_v54 = vpop.f32.mrf.mxu1 }
 0x2ec   : > { %v769_v56 = vadd.f32 %v768_v54, %v696_v53 }
 0x2ee   : > { %v773_v58 = vcombine.low %v767_v55, %v769_v56 }
 0x2f0   : > { %v780_v59 = vrot.slane %v773_v58, %v779_v57 }
 0x2f2   : > { %v787_v60 = vrot.slane %v780_v59, %v779_v57 }
 0x2f4   : > { %793 = vst.msk [vmem:[%s274_s6] sm:$0x3] %vm791_vm2, %v787_v60 }
 0x2f5   : > { %1051 = shalt.err (!%p1048_p3)
}
 0x2f6   : > { %s1052_s21 = scalar_lea.hbm %s807_s15, 32  ;;  %s1056_s23 = scalar_lea.hbm %s1374_s7, 64 }
 0x2f7   : > { %p1053_p4 = scmp.ne.s32.totalorder %s807_s15, %s1052_s21  ;;  %p1057_p9 = scmp.lt.s32.totalorder %s807_s15, %s1374_s7 }
 0x2f8   : > { %p1058_p10 = scmp.lt.s32.totalorder %s1056_s23, %s1052_s21 }
 0x2f9   : > { %p1054_p7 = pnand %p1053_p4, %p1182_p5 }
 0x2fa   : > { %p1059_p11 = por %p1058_p10, %p1057_p9 }
 0x2fb   : > { %p1055_p8 = pneg %p1054_p7 }
 0x2fd   : > { %p1060_p12 = pnand %p1059_p11, %p1055_p8 }
 0x2ff   : > { %1063 = shalt.err (!%p1060_p12)
}
 0x300   : > { %962 = dma.vmem_to_hbm [thread:$0]  (%p1182_p5), %s810_s30, 32, %s807_s15, %s795_s16  }
 0x301 PF: > { %p968_p13 = scmp.ge.s32.totalorder %s1098_s29, 2  ;;  %s821_s6 = sand.u32 1, %s1086_s26  }
 0x302   : > { %s822_s9 = scalar_lea.sflag [#allocation4], %s821_s6 }
 0x303   : > { %p965_p0 = pnand %p968_p13, %p1186_p6 }
 0x305   : > { %p966_p1 = pneg %p965_p0 }
 0x307   : > { %1081 = dma.done.wait (%p966_p1), %s822_s9, 32  }
 0x308   : > { %1083 = vsyncadd (%p966_p1), %s822_s9, 4294967264  ;;  %p19_p2 = scmp.ge.s32.totalorder %s1170_s8, 4   ;;  %s1377_s26 = smov %s1090_s27 }
 0x309   : > { %s1378_s27 = smov %s1094_s28  ;;  %s1379_s28 = smov %s1180_s11 }
 0x30a   : > { %s1380_s29 = smov %s1170_s8  ;;  %21 = sbr.rel (!%p19_p2) target bundleno = 6 (0x6), region = 83 }
 0x30f   :  { %827 = vsyncpa [#allocation4], 1 }
 0x310   :  { %829 = vsyncpa [#allocation4 + $0x1], 1 }

</bundles_post_ra>
